<compile_context>
chip_gen: v5e
topology: v5e:2x2
jax: 0.10.0
libtpu: 0.0.40
codegen_flags: <defaults>
</compile_context>

<pallas_src>
import math
from functools import partial

import jax
import jax.numpy as jnp
from jax.experimental import pallas as pl
from jax.experimental.pallas import tpu as pltpu

# ----- small, self-consistent config (ModelArgs semantics, shrunk) -------------
DIM = 64
N_HEADS = 4
N_KV_HEADS = 2
HEAD_DIM = DIM // N_HEADS            # 16
HALF = HEAD_DIM // 2                 # 8
N_REP = N_HEADS // N_KV_HEADS        # 2  (exercises repeat_interleave path)
MAX_SEQ_LEN = 16
SEQ_LEN = 8
START_POS = 4                        # static
NORM_EPS = 1e-5
FFN_DIM = 128                        # hidden_dim rounded up to multiple_of (lane-dense)

Q_W = N_HEADS * HEAD_DIM             # 64
KV_W = N_KV_HEADS * HEAD_DIM         # 32
QKV_W = Q_W + 2 * KV_W               # 128 (lane-dense projection width)


# ----- fused Pallas kernel -------------------------------------------------------
def _fused_block_kernel(x_ref, anorm_ref, wqkv_ref, wo_ref,
                        fnorm_ref, w13_ref, w2_ref,
                        cos_ref, sin_ref, mask_ref,
                        ck_in_ref, cv_in_ref,
                        out_ref, ck_out_ref, cv_out_ref,
                        *, start_pos, seq_len):
    """Whole TransformerBlock.forward (batch=1) in one kernel invocation.

    Layout notes:
      * wqkv = [wq | wk | wv]; wq/wk columns are pre-permuted per head from the
        interleaved (even, odd) RoPE pairing to [all evens | all odds].  The
        q.k dot product is invariant under this common permutation, so scores
        match the reference exactly, while RoPE becomes two contiguous slices.
      * cache_k therefore stores keys in the same per-head permuted layout (an
        internal representation choice; written and read consistently).
      * w13 = [w1 | w3] (gate | up), one lane-dense MXU pass.
    """
    scale = 1.0 / math.sqrt(HEAD_DIM)

    x = x_ref[...]                                                   # (S, DIM)

    # --- attention_norm (RMSNorm) ---------------------------------------------
    var = jnp.mean(x * x, axis=-1, keepdims=True)
    xn = x * jax.lax.rsqrt(var + NORM_EPS) * anorm_ref[...]          # (S, DIM)

    # --- fused QKV projection: one lane-dense (S,DIM)@(DIM,128) MXU pass -------
    qkv = jnp.dot(xn, wqkv_ref[...], preferred_element_type=jnp.float32)  # (S,128)

    cos = cos_ref[...]                    # (S, HEAD_DIM // 2)
    sin = sin_ref[...]

    # --- rotary embedding on q and k, all heads, in registers ------------------
    rot = []
    for hb in range(N_HEADS + N_KV_HEADS):
        base = hb * HEAD_DIM
        x0 = qkv[:, base:base + HALF]                 # "even" components
        x1 = qkv[:, base + HALF:base + HEAD_DIM]      # "odd" components
        rot.append(jnp.concatenate(
            [x0 * cos - x1 * sin, x0 * sin + x1 * cos], axis=1))     # (S, HEAD_DIM)
    q_heads = rot[:N_HEADS]                                          # H x (S, HEAD_DIM)
    xk_rot = jnp.concatenate(rot[N_HEADS:], axis=1)                  # (S, KV_W)
    xv = qkv[:, Q_W + KV_W:Q_W + 2 * KV_W]                           # (S, KV_W)

    # --- in-place (aliased) KV-cache update -------------------------------------
    old_k = ck_in_ref[...]
    old_v = cv_in_ref[...]
    ck_out_ref[...] = old_k     # self-copy when aliased; keeps non-alias path correct
    cv_out_ref[...] = old_v
    ck_out_ref[pl.ds(start_pos, seq_len), :] = xk_rot
    cv_out_ref[pl.ds(start_pos, seq_len), :] = xv

    if start_pos > 0:
        keys = jnp.concatenate([old_k[:start_pos, :], xk_rot], axis=0)   # (T, KV_W)
        values = jnp.concatenate([old_v[:start_pos, :], xv], axis=0)
    else:
        keys, values = xk_rot, xv

    # --- attention: all heads unrolled in this one invocation -------------------
    mask = mask_ref[...]                  # (S, T) additive causal mask
    out_heads = []
    for h in range(N_HEADS):
        kvh = h // N_REP                  # repeat_interleave: q head h -> kv head h//n_rep
        qh = q_heads[h]                                              # (S, HEAD_DIM)
        kh = keys[:, kvh * HEAD_DIM:(kvh + 1) * HEAD_DIM]            # (T, HEAD_DIM)
        vh = values[:, kvh * HEAD_DIM:(kvh + 1) * HEAD_DIM]          # (T, HEAD_DIM)
        s = jax.lax.dot_general(qh, kh, (((1,), (1,)), ((), ())),
                                preferred_element_type=jnp.float32) * scale
        s = s + mask
        m = jnp.max(s, axis=-1, keepdims=True)
        p = jnp.exp(s - m)
        p = p * pl.reciprocal(jnp.sum(p, axis=-1, keepdims=True), approx=True)
        out_heads.append(jnp.dot(p, vh, preferred_element_type=jnp.float32))
    attn = jnp.concatenate(out_heads, axis=1)                        # (S, Q_W) lane-dense

    # --- output projection + first residual -------------------------------------
    h_res = x + jnp.dot(attn, wo_ref[...], preferred_element_type=jnp.float32)

    # --- ffn_norm (RMSNorm) ------------------------------------------------------
    var2 = jnp.mean(h_res * h_res, axis=-1, keepdims=True)
    hn = h_res * jax.lax.rsqrt(var2 + NORM_EPS) * fnorm_ref[...]     # (S, DIM)

    # --- SwiGLU FFN: w1|w3 fused into one (DIM, 2*FFN) MXU pass ------------------
    g = jnp.dot(hn, w13_ref[...], preferred_element_type=jnp.float32)  # (S, 2*FFN)
    a = g[:, :FFN_DIM]                                               # gate (w1)
    b = g[:, FFN_DIM:]                                               # up   (w3)
    silu = a * (1.0 / (1.0 + jnp.exp(-a)))
    ffn = jnp.dot(silu * b, w2_ref[...], preferred_element_type=jnp.float32)  # (S, DIM)

    # --- second residual ---------------------------------------------------------
    out_ref[...] = h_res + ffn


def _vmem_spec():
    return pl.BlockSpec(memory_space=pltpu.MemorySpace.VMEM)


def fused_block(x2d, anorm_w, wqkv, wo, fnorm_w, w13, w2,
                cos, sin, mask, cache_k, cache_v, *, start_pos):
    """x2d:(S,DIM). Returns (out:(S,DIM), new_cache_k, new_cache_v); caches aliased in place."""
    seq_len = x2d.shape[0]
    kernel = partial(_fused_block_kernel, start_pos=start_pos, seq_len=seq_len)
    return pl.pallas_call(
        kernel,
        out_shape=(jax.ShapeDtypeStruct((seq_len, DIM), jnp.float32),
                   jax.ShapeDtypeStruct(cache_k.shape, jnp.float32),
                   jax.ShapeDtypeStruct(cache_v.shape, jnp.float32)),
        in_specs=[_vmem_spec()] * 12,
        out_specs=(_vmem_spec(), _vmem_spec(), _vmem_spec()),
        # cache_k / cache_v (inputs 10, 11) are updated in place (outputs 1, 2).
        input_output_aliases={10: 1, 11: 2},
    )(x2d, anorm_w, wqkv, wo, fnorm_w, w13, w2, cos, sin, mask, cache_k, cache_v)


# ----- offline weight folding ----------------------------------------------------
def _even_odd_perm(n_heads, head_dim):
    """Per-head column permutation: interleaved (even,odd) pairs -> [evens | odds]."""
    idx = []
    for h in range(n_heads):
        base = h * head_dim
        idx.extend(base + 2 * j for j in range(head_dim // 2))
        idx.extend(base + 2 * j + 1 for j in range(head_dim // 2))
    return jnp.asarray(idx, dtype=jnp.int32)


def fold_qkv_weights(wq, wk, wv):
    """Concatenate wq|wk|wv into one (DIM, 128) weight with RoPE pairing folded in."""
    wq_p = wq[:, _even_odd_perm(N_HEADS, HEAD_DIM)]
    wk_p = wk[:, _even_odd_perm(N_KV_HEADS, HEAD_DIM)]
    return jnp.concatenate([wq_p, wk_p, wv], axis=1)


# ----- module wrapper -------------------------------------------------------------
def init_params(key):
    ks = jax.random.split(key, 9)
    s = 0.05
    return dict(
        # stored already transposed: y = x @ w  (PyTorch Linear: y = x @ W^T)
        wq=jax.random.normal(ks[0], (DIM, Q_W), jnp.float32) * s,
        wk=jax.random.normal(ks[1], (DIM, KV_W), jnp.float32) * s,
        wv=jax.random.normal(ks[2], (DIM, KV_W), jnp.float32) * s,
        wo=jax.random.normal(ks[3], (Q_W, DIM), jnp.float32) * s,
        w1=jax.random.normal(ks[4], (DIM, FFN_DIM), jnp.float32) * s,
        w2=jax.random.normal(ks[5], (FFN_DIM, DIM), jnp.float32) * s,
        w3=jax.random.normal(ks[6], (DIM, FFN_DIM), jnp.float32) * s,
        attn_norm_w=1.0 + 0.1 * jax.random.normal(ks[7], (1, DIM), jnp.float32),
        ffn_norm_w=1.0 + 0.1 * jax.random.normal(ks[8], (1, DIM), jnp.float32),
        # KV cache kept 2D (seq, n_kv_heads*head_dim): lane-friendly, aliased in place.
        cache_k=jnp.zeros((MAX_SEQ_LEN, KV_W), jnp.float32),
        cache_v=jnp.zeros((MAX_SEQ_LEN, KV_W), jnp.float32),
    )


def precompute_cos_sin(head_dim, start_pos, seqlen, theta=10000.0):
    inv = 1.0 / (theta ** (jnp.arange(0, head_dim, 2, dtype=jnp.float32) / head_dim))
    t = jnp.arange(start_pos, start_pos + seqlen, dtype=jnp.float32)
    freqs = jnp.outer(t, inv)                      # (S, head_dim//2)
    return jnp.cos(freqs), jnp.sin(freqs)


def make_mask(seqlen, start_pos):
    mask = jnp.full((seqlen, seqlen), -jnp.inf, jnp.float32)
    mask = jnp.triu(mask, k=1)
    return jnp.concatenate(
        [jnp.zeros((seqlen, start_pos), jnp.float32), mask], axis=1)   # (S, T)


def block_forward(params, x, start_pos, cos, sin, mask):
    """Functional port of TransformerBlock.forward; returns (out, new_cache_k, new_cache_v)."""
    bsz, seq_len, _ = x.shape
    assert bsz == 1, "module's KV cache is allocated with batch=1"
    wqkv = fold_qkv_weights(params["wq"], params["wk"], params["wv"])   # offline foldable
    w13 = jnp.concatenate([params["w1"], params["w3"]], axis=1)          # offline foldable
    out2d, new_ck, new_cv = fused_block(
        x[0], params["attn_norm_w"], wqkv, params["wo"],
        params["ffn_norm_w"], w13, params["w2"],
        cos, sin, mask, params["cache_k"], params["cache_v"], start_pos=start_pos)
    return out2d[None], new_ck, new_cv


# ----- pure-JAX reference (mirrors the PyTorch module exactly) --------------------
def _rmsnorm_ref(x, w, eps=NORM_EPS):
    var = jnp.mean(x * x, axis=-1, keepdims=True)
    return x * jax.lax.rsqrt(var + eps) * w


def _attention_ref(params, x, start_pos, cos, sin, mask):
    bsz, S, _ = x.shape
    xq = (x @ params["wq"]).reshape(bsz, S, N_HEADS, HEAD_DIM)
    xk = (x @ params["wk"]).reshape(bsz, S, N_KV_HEADS, HEAD_DIM)
    xv = (x @ params["wv"]).reshape(bsz, S, N_KV_HEADS, HEAD_DIM)

    def rope(t):
        t0, t1 = t[..., 0::2], t[..., 1::2]
        c, s_ = cos[None, :, None, :], sin[None, :, None, :]
        return jnp.stack([t0 * c - t1 * s_, t0 * s_ + t1 * c], axis=-1).reshape(t.shape)

    xq, xk = rope(xq), rope(xk)
    cache_k = jnp.zeros((1, MAX_SEQ_LEN, N_KV_HEADS, HEAD_DIM), jnp.float32)
    cache_v = jnp.zeros((1, MAX_SEQ_LEN, N_KV_HEADS, HEAD_DIM), jnp.float32)
    cache_k = jax.lax.dynamic_update_slice(cache_k, xk, (0, start_pos, 0, 0))
    cache_v = jax.lax.dynamic_update_slice(cache_v, xv, (0, start_pos, 0, 0))
    T = start_pos + S
    keys = jnp.repeat(cache_k[:, :T], N_REP, axis=2)
    values = jnp.repeat(cache_v[:, :T], N_REP, axis=2)
    q = jnp.transpose(xq, (0, 2, 1, 3))
    k = jnp.transpose(keys, (0, 2, 1, 3))
    v = jnp.transpose(values, (0, 2, 1, 3))
    scores = jnp.einsum("bhsd,bhtd->bhst", q, k) / math.sqrt(HEAD_DIM)
    scores = scores + mask[None, None]
    p = jax.nn.softmax(scores, axis=-1)
    out = jnp.einsum("bhst,bhtd->bhsd", p, v)
    out = jnp.transpose(out, (0, 2, 1, 3)).reshape(bsz, S, -1)
    return out @ params["wo"]


def block_ref(params, x, start_pos, cos, sin, mask):
    """Pure-JAX mirror of TransformerBlock.forward."""
    attn_in = _rmsnorm_ref(x, params["attn_norm_w"][0])
    h = x + _attention_ref(params, attn_in, start_pos, cos, sin, mask)
    hn = _rmsnorm_ref(h, params["ffn_norm_w"][0])
    ffn = (jax.nn.silu(hn @ params["w1"]) * (hn @ params["w3"])) @ params["w2"]
    return h + ffn


if __name__ == "__main__":
    key = jax.random.PRNGKey(0)
    pkey, xkey = jax.random.split(key)
    params = init_params(pkey)
    x = jax.random.normal(xkey, (1, SEQ_LEN, DIM), jnp.float32) * 0.1
    cos, sin = precompute_cos_sin(HEAD_DIM, START_POS, SEQ_LEN)
    mask = make_mask(SEQ_LEN, START_POS)

    # reference first (kernel donates the cache buffers via input_output_aliases)
    ref = block_ref(params, x, START_POS, cos, sin, mask)

    out, new_ck, new_cv = block_forward(params, x, START_POS, cos, sin, mask)
    out = jax.block_until_ready(out)

    err = float(jnp.max(jnp.abs(out - ref)))
    assert jnp.allclose(out, ref, rtol=2e-2, atol=2e-2), f"max abs err {err}"
    print("KERNEL_OK")
</pallas_src>

<mosaic_0001>
module attributes {stable_mosaic.version = 11 : i64} {
  func.func @_fused_block_kernel(%arg0: memref<8x64xf32, #tpu.memory_space<vmem>>, %arg1: memref<1x64xf32, #tpu.memory_space<vmem>>, %arg2: memref<64x128xf32, #tpu.memory_space<vmem>>, %arg3: memref<64x64xf32, #tpu.memory_space<vmem>>, %arg4: memref<1x64xf32, #tpu.memory_space<vmem>>, %arg5: memref<64x256xf32, #tpu.memory_space<vmem>>, %arg6: memref<128x64xf32, #tpu.memory_space<vmem>>, %arg7: memref<8x8xf32, #tpu.memory_space<vmem>>, %arg8: memref<8x8xf32, #tpu.memory_space<vmem>>, %arg9: memref<8x12xf32, #tpu.memory_space<vmem>>, %arg10: memref<16x32xf32, #tpu.memory_space<vmem>>, %arg11: memref<16x32xf32, #tpu.memory_space<vmem>>, %arg12: memref<8x64xf32, #tpu.memory_space<vmem>>, %arg13: memref<16x32xf32, #tpu.memory_space<vmem>>, %arg14: memref<16x32xf32, #tpu.memory_space<vmem>>) attributes {dimension_semantics = [], scalar_prefetch = 0 : i64, scratch_operands = 0 : i64, tpu.core_type = #tpu.core_type<tc>} {
    %c0 = arith.constant 0 : index
    %c0_0 = arith.constant 0 : index
    %0 = vector.load %arg0[%c0, %c0_0] : memref<8x64xf32, #tpu.memory_space<vmem>>, vector<8x64xf32>
    %1 = arith.mulf %0, %0 : vector<8x64xf32>
    %cst = arith.constant dense<0.000000e+00> : vector<8xf32>
    %2 = vector.multi_reduction <add>, %1, %cst [1] : vector<8x64xf32> to vector<8xf32>
    %3 = vector.shape_cast %2 : vector<8xf32> to vector<8x1xf32>
    %cst_1 = arith.constant 6.400000e+01 : f32
    %4 = vector.broadcast %cst_1 : f32 to vector<8x1xf32>
    %5 = arith.divf %3, %4 : vector<8x1xf32>
    %cst_2 = arith.constant 9.99999974E-6 : f32
    %6 = vector.broadcast %cst_2 : f32 to vector<8x1xf32>
    %7 = arith.addf %5, %6 : vector<8x1xf32>
    %8 = math.rsqrt %7 : vector<8x1xf32>
    %9 = vector.broadcast %8 : vector<8x1xf32> to vector<8x64xf32>
    %10 = arith.mulf %0, %9 : vector<8x64xf32>
    %c0_3 = arith.constant 0 : index
    %c0_4 = arith.constant 0 : index
    %11 = vector.load %arg1[%c0_3, %c0_4] : memref<1x64xf32, #tpu.memory_space<vmem>>, vector<1x64xf32>
    %12 = vector.broadcast %11 : vector<1x64xf32> to vector<8x64xf32>
    %13 = arith.mulf %10, %12 : vector<8x64xf32>
    %c0_5 = arith.constant 0 : index
    %c0_6 = arith.constant 0 : index
    %14 = vector.load %arg2[%c0_5, %c0_6] : memref<64x128xf32, #tpu.memory_space<vmem>>, vector<64x128xf32>
    %cst_7 = arith.constant dense<0.000000e+00> : vector<8x128xf32>
    %15 = tpu.matmul %13, %14, %cst_7 {dimension_numbers = #tpu.dot_dimension_numbers<[1], [0], [0], [1], [0, 0, 1, 1], [], []>} : vector<8x64xf32>, vector<64x128xf32>, vector<8x128xf32> -> vector<8x128xf32>
    %c0_8 = arith.constant 0 : index
    %c0_9 = arith.constant 0 : index
    %16 = vector.load %arg7[%c0_8, %c0_9] : memref<8x8xf32, #tpu.memory_space<vmem>>, vector<8x8xf32>
    %c0_10 = arith.constant 0 : index
    %c0_11 = arith.constant 0 : index
    %17 = vector.load %arg8[%c0_10, %c0_11] : memref<8x8xf32, #tpu.memory_space<vmem>>, vector<8x8xf32>
    %18 = vector.extract_strided_slice %15 {offsets = [0, 0], sizes = [8, 8], strides = [1, 1]} : vector<8x128xf32> to vector<8x8xf32>
    %19 = vector.extract_strided_slice %15 {offsets = [0, 8], sizes = [8, 8], strides = [1, 1]} : vector<8x128xf32> to vector<8x8xf32>
    %20 = arith.mulf %18, %16 : vector<8x8xf32>
    %21 = arith.mulf %19, %17 : vector<8x8xf32>
    %22 = arith.subf %20, %21 : vector<8x8xf32>
    %23 = arith.mulf %18, %17 : vector<8x8xf32>
    %24 = arith.mulf %19, %16 : vector<8x8xf32>
    %25 = arith.addf %23, %24 : vector<8x8xf32>
    %26 = tpu.concatenate %22, %25 in 1 : vector<8x8xf32>, vector<8x8xf32> -> vector<8x16xf32>
    %27 = vector.extract_strided_slice %15 {offsets = [0, 16], sizes = [8, 8], strides = [1, 1]} : vector<8x128xf32> to vector<8x8xf32>
    %28 = vector.extract_strided_slice %15 {offsets = [0, 24], sizes = [8, 8], strides = [1, 1]} : vector<8x128xf32> to vector<8x8xf32>
    %29 = arith.mulf %27, %16 : vector<8x8xf32>
    %30 = arith.mulf %28, %17 : vector<8x8xf32>
    %31 = arith.subf %29, %30 : vector<8x8xf32>
    %32 = arith.mulf %27, %17 : vector<8x8xf32>
    %33 = arith.mulf %28, %16 : vector<8x8xf32>
    %34 = arith.addf %32, %33 : vector<8x8xf32>
    %35 = tpu.concatenate %31, %34 in 1 : vector<8x8xf32>, vector<8x8xf32> -> vector<8x16xf32>
    %36 = vector.extract_strided_slice %15 {offsets = [0, 32], sizes = [8, 8], strides = [1, 1]} : vector<8x128xf32> to vector<8x8xf32>
    %37 = vector.extract_strided_slice %15 {offsets = [0, 40], sizes = [8, 8], strides = [1, 1]} : vector<8x128xf32> to vector<8x8xf32>
    %38 = arith.mulf %36, %16 : vector<8x8xf32>
    %39 = arith.mulf %37, %17 : vector<8x8xf32>
    %40 = arith.subf %38, %39 : vector<8x8xf32>
    %41 = arith.mulf %36, %17 : vector<8x8xf32>
    %42 = arith.mulf %37, %16 : vector<8x8xf32>
    %43 = arith.addf %41, %42 : vector<8x8xf32>
    %44 = tpu.concatenate %40, %43 in 1 : vector<8x8xf32>, vector<8x8xf32> -> vector<8x16xf32>
    %45 = vector.extract_strided_slice %15 {offsets = [0, 48], sizes = [8, 8], strides = [1, 1]} : vector<8x128xf32> to vector<8x8xf32>
    %46 = vector.extract_strided_slice %15 {offsets = [0, 56], sizes = [8, 8], strides = [1, 1]} : vector<8x128xf32> to vector<8x8xf32>
    %47 = arith.mulf %45, %16 : vector<8x8xf32>
    %48 = arith.mulf %46, %17 : vector<8x8xf32>
    %49 = arith.subf %47, %48 : vector<8x8xf32>
    %50 = arith.mulf %45, %17 : vector<8x8xf32>
    %51 = arith.mulf %46, %16 : vector<8x8xf32>
    %52 = arith.addf %50, %51 : vector<8x8xf32>
    %53 = tpu.concatenate %49, %52 in 1 : vector<8x8xf32>, vector<8x8xf32> -> vector<8x16xf32>
    %54 = vector.extract_strided_slice %15 {offsets = [0, 64], sizes = [8, 8], strides = [1, 1]} : vector<8x128xf32> to vector<8x8xf32>
    %55 = vector.extract_strided_slice %15 {offsets = [0, 72], sizes = [8, 8], strides = [1, 1]} : vector<8x128xf32> to vector<8x8xf32>
    %56 = arith.mulf %54, %16 : vector<8x8xf32>
    %57 = arith.mulf %55, %17 : vector<8x8xf32>
    %58 = arith.subf %56, %57 : vector<8x8xf32>
    %59 = arith.mulf %54, %17 : vector<8x8xf32>
    %60 = arith.mulf %55, %16 : vector<8x8xf32>
    %61 = arith.addf %59, %60 : vector<8x8xf32>
    %62 = tpu.concatenate %58, %61 in 1 : vector<8x8xf32>, vector<8x8xf32> -> vector<8x16xf32>
    %63 = vector.extract_strided_slice %15 {offsets = [0, 80], sizes = [8, 8], strides = [1, 1]} : vector<8x128xf32> to vector<8x8xf32>
    %64 = vector.extract_strided_slice %15 {offsets = [0, 88], sizes = [8, 8], strides = [1, 1]} : vector<8x128xf32> to vector<8x8xf32>
    %65 = arith.mulf %63, %16 : vector<8x8xf32>
    %66 = arith.mulf %64, %17 : vector<8x8xf32>
    %67 = arith.subf %65, %66 : vector<8x8xf32>
    %68 = arith.mulf %63, %17 : vector<8x8xf32>
    %69 = arith.mulf %64, %16 : vector<8x8xf32>
    %70 = arith.addf %68, %69 : vector<8x8xf32>
    %71 = tpu.concatenate %67, %70 in 1 : vector<8x8xf32>, vector<8x8xf32> -> vector<8x16xf32>
    %72 = tpu.concatenate %62, %71 in 1 : vector<8x16xf32>, vector<8x16xf32> -> vector<8x32xf32>
    %73 = vector.extract_strided_slice %15 {offsets = [0, 96], sizes = [8, 32], strides = [1, 1]} : vector<8x128xf32> to vector<8x32xf32>
    %c0_12 = arith.constant 0 : index
    %c0_13 = arith.constant 0 : index
    %74 = vector.load %arg10[%c0_12, %c0_13] : memref<16x32xf32, #tpu.memory_space<vmem>>, vector<16x32xf32>
    %c0_14 = arith.constant 0 : index
    %c0_15 = arith.constant 0 : index
    %75 = vector.load %arg11[%c0_14, %c0_15] : memref<16x32xf32, #tpu.memory_space<vmem>>, vector<16x32xf32>
    %c0_16 = arith.constant 0 : index
    %c0_17 = arith.constant 0 : index
    %76 = vector.load %arg13[%c0_16, %c0_17] : memref<16x32xf32, #tpu.memory_space<vmem>>, vector<16x32xf32>
    tpu.vector_store %arg13[%c0_16, %c0_17], %74 {strides = array<i32>} : memref<16x32xf32, #tpu.memory_space<vmem>>, vector<16x32xf32>,
    %c0_18 = arith.constant 0 : index
    %c0_19 = arith.constant 0 : index
    %77 = vector.load %arg14[%c0_18, %c0_19] : memref<16x32xf32, #tpu.memory_space<vmem>>, vector<16x32xf32>
    tpu.vector_store %arg14[%c0_18, %c0_19], %75 {strides = array<i32>} : memref<16x32xf32, #tpu.memory_space<vmem>>, vector<16x32xf32>,
    %c4 = arith.constant 4 : index
    %c0_20 = arith.constant 0 : index
    %78 = vector.load %arg13[%c4, %c0_20] : memref<16x32xf32, #tpu.memory_space<vmem>>, vector<8x32xf32>
    tpu.vector_store %arg13[%c4, %c0_20], %72 {strides = array<i32>} : memref<16x32xf32, #tpu.memory_space<vmem>>, vector<8x32xf32>,
    %c4_21 = arith.constant 4 : index
    %c0_22 = arith.constant 0 : index
    %79 = vector.load %arg14[%c4_21, %c0_22] : memref<16x32xf32, #tpu.memory_space<vmem>>, vector<8x32xf32>
    tpu.vector_store %arg14[%c4_21, %c0_22], %73 {strides = array<i32>} : memref<16x32xf32, #tpu.memory_space<vmem>>, vector<8x32xf32>,
    %80 = vector.extract_strided_slice %74 {offsets = [0, 0], sizes = [4, 32], strides = [1, 1]} : vector<16x32xf32> to vector<4x32xf32>
    %81 = tpu.concatenate %80, %72 in 0 : vector<4x32xf32>, vector<8x32xf32> -> vector<12x32xf32>
    %82 = vector.extract_strided_slice %75 {offsets = [0, 0], sizes = [4, 32], strides = [1, 1]} : vector<16x32xf32> to vector<4x32xf32>
    %83 = tpu.concatenate %82, %73 in 0 : vector<4x32xf32>, vector<8x32xf32> -> vector<12x32xf32>
    %c0_23 = arith.constant 0 : index
    %c0_24 = arith.constant 0 : index
    %84 = vector.load %arg9[%c0_23, %c0_24] : memref<8x12xf32, #tpu.memory_space<vmem>>, vector<8x12xf32>
    %85 = vector.extract_strided_slice %81 {offsets = [0, 0], sizes = [12, 16], strides = [1, 1]} : vector<12x32xf32> to vector<12x16xf32>
    %86 = vector.extract_strided_slice %83 {offsets = [0, 0], sizes = [12, 16], strides = [1, 1]} : vector<12x32xf32> to vector<12x16xf32>
    %cst_25 = arith.constant dense<0.000000e+00> : vector<8x12xf32>
    %87 = tpu.matmul %26, %85, %cst_25 {dimension_numbers = #tpu.dot_dimension_numbers<[1], [1], [0], [0], [0, 0, 1, 0], [], []>} : vector<8x16xf32>, vector<12x16xf32>, vector<8x12xf32> -> vector<8x12xf32>
    %cst_26 = arith.constant 2.500000e-01 : f32
    %88 = vector.broadcast %cst_26 : f32 to vector<8x12xf32>
    %89 = arith.mulf %87, %88 : vector<8x12xf32>
    %90 = arith.addf %89, %84 : vector<8x12xf32>
    %cst_27 = arith.constant dense<0xFF800000> : vector<8xf32>
    %91 = vector.multi_reduction <maximumf>, %90, %cst_27 [1] : vector<8x12xf32> to vector<8xf32>
    %92 = vector.shape_cast %91 : vector<8xf32> to vector<8x1xf32>
    %93 = vector.broadcast %92 : vector<8x1xf32> to vector<8x12xf32>
    %94 = arith.subf %90, %93 : vector<8x12xf32>
    %95 = math.exp %94 : vector<8x12xf32>
    %cst_28 = arith.constant dense<0.000000e+00> : vector<8xf32>
    %96 = vector.multi_reduction <add>, %95, %cst_28 [1] : vector<8x12xf32> to vector<8xf32>
    %97 = vector.shape_cast %96 : vector<8xf32> to vector<8x1xf32>
    %98 = tpu.reciprocal %97 {approx = true} : vector<8x1xf32> -> vector<8x1xf32>
    %99 = vector.broadcast %98 : vector<8x1xf32> to vector<8x12xf32>
    %100 = arith.mulf %95, %99 : vector<8x12xf32>
    %cst_29 = arith.constant dense<0.000000e+00> : vector<8x16xf32>
    %101 = tpu.matmul %100, %86, %cst_29 {dimension_numbers = #tpu.dot_dimension_numbers<[1], [0], [0], [1], [0, 0, 1, 1], [], []>} : vector<8x12xf32>, vector<12x16xf32>, vector<8x16xf32> -> vector<8x16xf32>
    %102 = vector.extract_strided_slice %81 {offsets = [0, 0], sizes = [12, 16], strides = [1, 1]} : vector<12x32xf32> to vector<12x16xf32>
    %103 = vector.extract_strided_slice %83 {offsets = [0, 0], sizes = [12, 16], strides = [1, 1]} : vector<12x32xf32> to vector<12x16xf32>
    %cst_30 = arith.constant dense<0.000000e+00> : vector<8x12xf32>
    %104 = tpu.matmul %35, %102, %cst_30 {dimension_numbers = #tpu.dot_dimension_numbers<[1], [1], [0], [0], [0, 0, 1, 0], [], []>} : vector<8x16xf32>, vector<12x16xf32>, vector<8x12xf32> -> vector<8x12xf32>
    %cst_31 = arith.constant 2.500000e-01 : f32
    %105 = vector.broadcast %cst_31 : f32 to vector<8x12xf32>
    %106 = arith.mulf %104, %105 : vector<8x12xf32>
    %107 = arith.addf %106, %84 : vector<8x12xf32>
    %cst_32 = arith.constant dense<0xFF800000> : vector<8xf32>
    %108 = vector.multi_reduction <maximumf>, %107, %cst_32 [1] : vector<8x12xf32> to vector<8xf32>
    %109 = vector.shape_cast %108 : vector<8xf32> to vector<8x1xf32>
    %110 = vector.broadcast %109 : vector<8x1xf32> to vector<8x12xf32>
    %111 = arith.subf %107, %110 : vector<8x12xf32>
    %112 = math.exp %111 : vector<8x12xf32>
    %cst_33 = arith.constant dense<0.000000e+00> : vector<8xf32>
    %113 = vector.multi_reduction <add>, %112, %cst_33 [1] : vector<8x12xf32> to vector<8xf32>
    %114 = vector.shape_cast %113 : vector<8xf32> to vector<8x1xf32>
    %115 = tpu.reciprocal %114 {approx = true} : vector<8x1xf32> -> vector<8x1xf32>
    %116 = vector.broadcast %115 : vector<8x1xf32> to vector<8x12xf32>
    %117 = arith.mulf %112, %116 : vector<8x12xf32>
    %cst_34 = arith.constant dense<0.000000e+00> : vector<8x16xf32>
    %118 = tpu.matmul %117, %103, %cst_34 {dimension_numbers = #tpu.dot_dimension_numbers<[1], [0], [0], [1], [0, 0, 1, 1], [], []>} : vector<8x12xf32>, vector<12x16xf32>, vector<8x16xf32> -> vector<8x16xf32>
    %119 = vector.extract_strided_slice %81 {offsets = [0, 16], sizes = [12, 16], strides = [1, 1]} : vector<12x32xf32> to vector<12x16xf32>
    %120 = vector.extract_strided_slice %83 {offsets = [0, 16], sizes = [12, 16], strides = [1, 1]} : vector<12x32xf32> to vector<12x16xf32>
    %cst_35 = arith.constant dense<0.000000e+00> : vector<8x12xf32>
    %121 = tpu.matmul %44, %119, %cst_35 {dimension_numbers = #tpu.dot_dimension_numbers<[1], [1], [0], [0], [0, 0, 1, 0], [], []>} : vector<8x16xf32>, vector<12x16xf32>, vector<8x12xf32> -> vector<8x12xf32>
    %cst_36 = arith.constant 2.500000e-01 : f32
    %122 = vector.broadcast %cst_36 : f32 to vector<8x12xf32>
    %123 = arith.mulf %121, %122 : vector<8x12xf32>
    %124 = arith.addf %123, %84 : vector<8x12xf32>
    %cst_37 = arith.constant dense<0xFF800000> : vector<8xf32>
    %125 = vector.multi_reduction <maximumf>, %124, %cst_37 [1] : vector<8x12xf32> to vector<8xf32>
    %126 = vector.shape_cast %125 : vector<8xf32> to vector<8x1xf32>
    %127 = vector.broadcast %126 : vector<8x1xf32> to vector<8x12xf32>
    %128 = arith.subf %124, %127 : vector<8x12xf32>
    %129 = math.exp %128 : vector<8x12xf32>
    %cst_38 = arith.constant dense<0.000000e+00> : vector<8xf32>
    %130 = vector.multi_reduction <add>, %129, %cst_38 [1] : vector<8x12xf32> to vector<8xf32>
    %131 = vector.shape_cast %130 : vector<8xf32> to vector<8x1xf32>
    %132 = tpu.reciprocal %131 {approx = true} : vector<8x1xf32> -> vector<8x1xf32>
    %133 = vector.broadcast %132 : vector<8x1xf32> to vector<8x12xf32>
    %134 = arith.mulf %129, %133 : vector<8x12xf32>
    %cst_39 = arith.constant dense<0.000000e+00> : vector<8x16xf32>
    %135 = tpu.matmul %134, %120, %cst_39 {dimension_numbers = #tpu.dot_dimension_numbers<[1], [0], [0], [1], [0, 0, 1, 1], [], []>} : vector<8x12xf32>, vector<12x16xf32>, vector<8x16xf32> -> vector<8x16xf32>
    %136 = vector.extract_strided_slice %81 {offsets = [0, 16], sizes = [12, 16], strides = [1, 1]} : vector<12x32xf32> to vector<12x16xf32>
    %137 = vector.extract_strided_slice %83 {offsets = [0, 16], sizes = [12, 16], strides = [1, 1]} : vector<12x32xf32> to vector<12x16xf32>
    %cst_40 = arith.constant dense<0.000000e+00> : vector<8x12xf32>
    %138 = tpu.matmul %53, %136, %cst_40 {dimension_numbers = #tpu.dot_dimension_numbers<[1], [1], [0], [0], [0, 0, 1, 0], [], []>} : vector<8x16xf32>, vector<12x16xf32>, vector<8x12xf32> -> vector<8x12xf32>
    %cst_41 = arith.constant 2.500000e-01 : f32
    %139 = vector.broadcast %cst_41 : f32 to vector<8x12xf32>
    %140 = arith.mulf %138, %139 : vector<8x12xf32>
    %141 = arith.addf %140, %84 : vector<8x12xf32>
    %cst_42 = arith.constant dense<0xFF800000> : vector<8xf32>
    %142 = vector.multi_reduction <maximumf>, %141, %cst_42 [1] : vector<8x12xf32> to vector<8xf32>
    %143 = vector.shape_cast %142 : vector<8xf32> to vector<8x1xf32>
    %144 = vector.broadcast %143 : vector<8x1xf32> to vector<8x12xf32>
    %145 = arith.subf %141, %144 : vector<8x12xf32>
    %146 = math.exp %145 : vector<8x12xf32>
    %cst_43 = arith.constant dense<0.000000e+00> : vector<8xf32>
    %147 = vector.multi_reduction <add>, %146, %cst_43 [1] : vector<8x12xf32> to vector<8xf32>
    %148 = vector.shape_cast %147 : vector<8xf32> to vector<8x1xf32>
    %149 = tpu.reciprocal %148 {approx = true} : vector<8x1xf32> -> vector<8x1xf32>
    %150 = vector.broadcast %149 : vector<8x1xf32> to vector<8x12xf32>
    %151 = arith.mulf %146, %150 : vector<8x12xf32>
    %cst_44 = arith.constant dense<0.000000e+00> : vector<8x16xf32>
    %152 = tpu.matmul %151, %137, %cst_44 {dimension_numbers = #tpu.dot_dimension_numbers<[1], [0], [0], [1], [0, 0, 1, 1], [], []>} : vector<8x12xf32>, vector<12x16xf32>, vector<8x16xf32> -> vector<8x16xf32>
    %153 = tpu.concatenate %101, %118, %135, %152 in 1 : vector<8x16xf32>, vector<8x16xf32>, vector<8x16xf32>, vector<8x16xf32> -> vector<8x64xf32>
    %c0_45 = arith.constant 0 : index
    %c0_46 = arith.constant 0 : index
    %154 = vector.load %arg3[%c0_45, %c0_46] : memref<64x64xf32, #tpu.memory_space<vmem>>, vector<64x64xf32>
    %cst_47 = arith.constant dense<0.000000e+00> : vector<8x64xf32>
    %155 = tpu.matmul %153, %154, %cst_47 {dimension_numbers = #tpu.dot_dimension_numbers<[1], [0], [0], [1], [0, 0, 1, 1], [], []>} : vector<8x64xf32>, vector<64x64xf32>, vector<8x64xf32> -> vector<8x64xf32>
    %156 = arith.addf %0, %155 : vector<8x64xf32>
    %157 = arith.mulf %156, %156 : vector<8x64xf32>
    %cst_48 = arith.constant dense<0.000000e+00> : vector<8xf32>
    %158 = vector.multi_reduction <add>, %157, %cst_48 [1] : vector<8x64xf32> to vector<8xf32>
    %159 = vector.shape_cast %158 : vector<8xf32> to vector<8x1xf32>
    %cst_49 = arith.constant 6.400000e+01 : f32
    %160 = vector.broadcast %cst_49 : f32 to vector<8x1xf32>
    %161 = arith.divf %159, %160 : vector<8x1xf32>
    %cst_50 = arith.constant 9.99999974E-6 : f32
    %162 = vector.broadcast %cst_50 : f32 to vector<8x1xf32>
    %163 = arith.addf %161, %162 : vector<8x1xf32>
    %164 = math.rsqrt %163 : vector<8x1xf32>
    %165 = vector.broadcast %164 : vector<8x1xf32> to vector<8x64xf32>
    %166 = arith.mulf %156, %165 : vector<8x64xf32>
    %c0_51 = arith.constant 0 : index
    %c0_52 = arith.constant 0 : index
    %167 = vector.load %arg4[%c0_51, %c0_52] : memref<1x64xf32, #tpu.memory_space<vmem>>, vector<1x64xf32>
    %168 = vector.broadcast %167 : vector<1x64xf32> to vector<8x64xf32>
    %169 = arith.mulf %166, %168 : vector<8x64xf32>
    %c0_53 = arith.constant 0 : index
    %c0_54 = arith.constant 0 : index
    %170 = vector.load %arg5[%c0_53, %c0_54] : memref<64x256xf32, #tpu.memory_space<vmem>>, vector<64x256xf32>
    %cst_55 = arith.constant dense<0.000000e+00> : vector<8x256xf32>
    %171 = tpu.matmul %169, %170, %cst_55 {dimension_numbers = #tpu.dot_dimension_numbers<[1], [0], [0], [1], [0, 0, 1, 1], [], []>} : vector<8x64xf32>, vector<64x256xf32>, vector<8x256xf32> -> vector<8x256xf32>
    %172 = vector.extract_strided_slice %171 {offsets = [0, 0], sizes = [8, 128], strides = [1, 1]} : vector<8x256xf32> to vector<8x128xf32>
    %173 = vector.extract_strided_slice %171 {offsets = [0, 128], sizes = [8, 128], strides = [1, 1]} : vector<8x256xf32> to vector<8x128xf32>
    %cst_56 = arith.constant 0.000000e+00 : f32
    %174 = vector.broadcast %cst_56 : f32 to vector<8x128xf32>
    %175 = arith.subf %174, %172 : vector<8x128xf32>
    %176 = math.exp %175 : vector<8x128xf32>
    %cst_57 = arith.constant 1.000000e+00 : f32
    %177 = vector.broadcast %cst_57 : f32 to vector<8x128xf32>
    %178 = arith.addf %177, %176 : vector<8x128xf32>
    %cst_58 = arith.constant 1.000000e+00 : f32
    %179 = vector.broadcast %cst_58 : f32 to vector<8x128xf32>
    %180 = arith.divf %179, %178 : vector<8x128xf32>
    %181 = arith.mulf %172, %180 : vector<8x128xf32>
    %182 = arith.mulf %181, %173 : vector<8x128xf32>
    %c0_59 = arith.constant 0 : index
    %c0_60 = arith.constant 0 : index
    %183 = vector.load %arg6[%c0_59, %c0_60] : memref<128x64xf32, #tpu.memory_space<vmem>>, vector<128x64xf32>
    %cst_61 = arith.constant dense<0.000000e+00> : vector<8x64xf32>
    %184 = tpu.matmul %182, %183, %cst_61 {dimension_numbers = #tpu.dot_dimension_numbers<[1], [0], [0], [1], [0, 0, 1, 1], [], []>} : vector<8x128xf32>, vector<128x64xf32>, vector<8x64xf32> -> vector<8x64xf32>
    %185 = arith.addf %156, %184 : vector<8x64xf32>
    %c0_62 = arith.constant 0 : index
    %c0_63 = arith.constant 0 : index
    %186 = vector.load %arg12[%c0_62, %c0_63] : memref<8x64xf32, #tpu.memory_space<vmem>>, vector<8x64xf32>
    tpu.vector_store %arg12[%c0_62, %c0_63], %185 {strides = array<i32>} : memref<8x64xf32, #tpu.memory_space<vmem>>, vector<8x64xf32>,
    return
  }
}

</mosaic_0001>

<bundles_post_ra>
// kernel: tpu_custom_call.1
= control target key start
LH: loop header
LB: loop body
LE: loop exit
PB: predicated region body
PF: predicated region fallthrough
CT: control target
= control target key end

     0   :  { %20 = vsyncpa [#allocation3], 0  ;;  %s1791_s0 = inlined_call_operand.vmem [shape: f32[8,64], index: 0, kind: input, shape index: {}]   ;;  %s1792_s1 = inlined_call_operand.hbm [shape: f32[1,64], index: 1, kind: input, shape index: {}]   ;;  %s1793_s2 = inlined_call_operand.vmem [shape: f32[64,128], index: 2, kind: input, shape index: {}]   ;;  %s1794_s3 = inlined_call_operand.hbm [shape: f32[64,64], index: 3, kind: input, shape index: {}]   ;;  %s1795_s4 = inlined_call_operand.hbm [shape: f32[1,64], index: 4, kind: input, shape index: {}]   ;;  %s1796_s5 = inlined_call_operand.vmem [shape: f32[64,256], index: 5, kind: input, shape index: {}]   ;;  %s1797_s6 = inlined_call_operand.vmem [shape: f32[128,64], index: 6, kind: input, shape index: {}]   ;;  %s1798_s7 = inlined_call_operand.hbm [shape: f32[8,8], index: 7, kind: input, shape index: {}]   ;;  %s1799_s8 = inlined_call_operand.hbm [shape: f32[8,8], index: 8, kind: input, shape index: {}]   ;;  %s1800_s9 = inlined_call_operand.hbm [shape: f32[8,12], index: 9, kind: input, shape index: {}]   ;;  %s1801_s10 = inlined_call_operand.hbm [shape: f32[16,32], index: 10, kind: input, shape index: {}, may-alias: {10,13}]   ;;  %s1802_s11 = inlined_call_operand.hbm [shape: f32[16,32], index: 11, kind: input, shape index: {}, may-alias: {11,14}]   ;;  %s1803_s12 = inlined_call_operand.hbm [shape: f32[8,64], index: 12, kind: output, shape index: {0}]   ;;  %s1804_s13 = inlined_call_operand.hbm [shape: f32[16,32], index: 13, kind: output, shape index: {1}, may-alias: {10,13}]   ;;  %s1805_s14 = inlined_call_operand.hbm [shape: f32[16,32], index: 14, kind: output, shape index: {2}, may-alias: {11,14}]  }
   0x1   :  { %21 = vsyncpa [#allocation6], 0 }
   0x2   :  { %22 = vsyncpa [#allocation9], 0 }
   0x3   :  { %23 = vsyncpa [#allocation12], 0 }
   0x4   :  { %24 = vsyncpa [#allocation15], 0 }
   0x5   :  { %25 = vsyncpa [#allocation4], 0  ;;  %s46_s15 = sshll.u32 %s1794_s3, 4  ;;  %s47_s15 = int_to_ptr.hbm [resolvable:$true] %s46_s15 }
   0x6   :  { %26 = vsyncpa [#allocation18], 0  ;;  %s1322_s16 = smov [#allocation5]   ;;  %s75_s20 = sshll.u32 %s1798_s7, 4  ;;  %s76_s20 = int_to_ptr.hbm [resolvable:$true] %s75_s20 }
   0x7   :  { %s48_s17 = sshll.u32 %s1322_s16, 4  ;;  %s1323_s21 = smov 128   ;;  %s49_s17 = int_to_ptr.vmem [resolvable:$true] %s48_s17 }
   0x8   :  { %s1324_s22 = smov 8   ;;  %s1325_s23 = smov [#allocation8]  }
   0x9   :  { %54 = dma.hbm_to_vmem [thread:$0]  %s47_s15, 1024, %s49_s17, [#allocation6], %s1323_s21, %s1323_s21, %s1324_s22  }
   0xa   :  { %s77_s24 = sshll.u32 %s1325_s23, 4  ;;  %s97_s26 = sshll.u32 %s1800_s9, 4  ;;  %s78_s24 = int_to_ptr.vmem [resolvable:$true] %s77_s24  ;;  %s98_s26 = int_to_ptr.hbm [resolvable:$true] %s97_s26 }
   0xb   :  { %80 = dma.hbm_to_vmem [thread:$0]  %s76_s20, 128, %s78_s24, [#allocation9]  }
   0xc   :  { %s34_s7 = sshll.u32 %s1792_s1, 4  ;;  %s1326_s29 = smov [#allocation11]   ;;  %s35_s7 = int_to_ptr.hbm [resolvable:$true] %s34_s7 }
   0xd   :  { %s99_s30 = sshll.u32 %s1326_s29, 4  ;;  %s1327_s15 = smov [#allocation2]   ;;  %s100_s30 = int_to_ptr.vmem [resolvable:$true] %s99_s30 }
   0xe   :  { %102 = dma.hbm_to_vmem [thread:$0]  %s98_s26, 128, %s100_s30, [#allocation12]  }
   0xf   :  { %s36_s16 = sshll.u32 %s1327_s15, 4  ;;  %s60_s19 = sshll.u32 %s1795_s4, 4  ;;  %s37_s16 = int_to_ptr.vmem [resolvable:$true] %s36_s16  ;;  %s61_s19 = int_to_ptr.hbm [resolvable:$true] %s60_s19 }
  0x10   :  { %39 = dma.hbm_to_vmem [thread:$0]  %s35_s7, 16, %s37_s16, [#allocation3]  }
  0x11   :  { %s86_s23 = sshll.u32 %s1799_s8, 4  ;;  %s1328_s24 = smov [#allocation7]   ;;  %s87_s23 = int_to_ptr.hbm [resolvable:$true] %s86_s23 }
  0x12   :  { %s62_s1 = sshll.u32 %s1328_s24, 4  ;;  %s1329_s25 = smov [#allocation10]   ;;  %s63_s1 = int_to_ptr.vmem [resolvable:$true] %s62_s1 }
  0x13   :  { %65 = dma.hbm_to_vmem [thread:$0]  %s61_s19, 16, %s63_s1, [#allocation6]  }
  0x14   :  { %s88_s3 = sshll.u32 %s1329_s25, 4  ;;  %s107_s28 = sshll.u32 %s1801_s10, 4  ;;  %s89_s3 = int_to_ptr.vmem [resolvable:$true] %s88_s3  ;;  %s108_s28 = int_to_ptr.hbm [resolvable:$true] %s107_s28 }
  0x15   :  { %91 = dma.hbm_to_vmem [thread:$0]  %s87_s23, 128, %s89_s3, [#allocation9]  }
  0x16   :  { %s120_s29 = sshll.u32 %s1802_s11, 4  ;;  %s1330_s30 = smov [#allocation13]   ;;  %s121_s29 = int_to_ptr.hbm [resolvable:$true] %s120_s29 }
  0x17   :  { %s109_s8 = sshll.u32 %s1330_s30, 4  ;;  %s1331_s15 = smov [#allocation14]   ;;  %s110_s8 = int_to_ptr.vmem [resolvable:$true] %s109_s8 }
  0x18   :  { %115 = dma.hbm_to_vmem [thread:$0]  %s108_s28, 256, %s110_s8, [#allocation12], %s1323_s21, %s1323_s21, %s1324_s22  }
  0x19   :  { %s122_s16 = sshll.u32 %s1331_s15, 4  ;;  %s123_s16 = int_to_ptr.vmem [resolvable:$true] %s122_s16 }
  0x1a   :  { %128 = dma.hbm_to_vmem [thread:$0]  %s121_s29, 256, %s123_s16, [#allocation15], %s1323_s21, %s1323_s21, %s1324_s22  }
  0x1b   :  { %1308 = dma.done.wait [#allocation3], 16  }
  0x1c   :  { %1309 = vsyncadd [#allocation3], 4294967280 }
  0x1d   :  { %1310 = dma.done.wait [#allocation6], 1040  }
  0x1e   :  { %1311 = vsyncadd [#allocation6], 4294966256 }
  0x1f   :  { %1312 = dma.done.wait [#allocation9], 256  }
  0x20   :  { %1313 = vsyncadd [#allocation9], 4294967040 }
  0x21   :  { %1314 = dma.done.wait [#allocation12], 384  }
  0x22   :  { %1315 = vsyncadd [#allocation12], 4294966912 }
  0x23   :  { %1316 = dma.done.wait [#allocation15], 256  }
  0x24   :  { %1317 = vsyncadd [#allocation15], 4294967040  ;;  %v1461_v0 = vld [vmem:[%s1791_s0] sm:$0xff]  ;;  %vm163_vm0 = vcmask 523264   ;;  %v1332_v3 = vmov 64.0   ;;  %v199_v5 = vld [vmem:[%s1793_s2 + $0x38] sm:$0xff] }
  0x25   :  { %v162_v1 = vmul.f32 %v1461_v0, %v1461_v0  ;;  %1018 = vrcp.f32 %v1332_v3  ;;  %211 = vmatpush.msra.mxu1 %v199_v5  ;;  %v198_v6 = vld [vmem:[%s1793_s2 + $0x30] sm:$0xff]  ;;  %v197_v8 = vld [vmem:[%s1793_s2 + $0x28] sm:$0xff]  ;;  %v196_v9 = vld [vmem:[%s1793_s2 + $0x20] sm:$0xff]  ;;  %s1333_s27 = smov 88   ;;  %s1334_s7 = smov 72   ;;  %vm251_vm5 = vcmask 64512  }
  0x26   :  { %v195_v11 = vld [vmem:[%s1793_s2 + $0x18] sm:$0xff]  ;;  %v1481_v12 = vld [vmem:[#allocation8] sm:$0xff]  ;;  %v194_v13 = vld [vmem:[%s1793_s2 + $0x10] sm:$0xff]  ;;  %s1335_s8 = smov 24   ;;  %s1336_s15 = smov 80   ;;  %vm438_vm6 = vcmask 261120  }
  0x27   :  { %v164_v2 = vsel %vm163_vm0, %v162_v1, 0.0  ;;  %212 = vmatpush.msra.mxu1 %v198_v6  ;;  %v1486_v14 = vld [vmem:[#allocation10] sm:$0xff]  ;;  %410 = vrot.lane.b32.xlu1 %v1481_v12, %s1333_s27  ;;  %v192_v17 = vld [vmem:[%s1793_s2] sm:$0xff]  ;;  %s1338_s16 = smov 120   ;;  %s1339_s10 = smov 16   ;;  %vm432_vm7 = vcmask 130048  }
  0x28   :  { %165 = vadd.xlane.f32.xlu0 %v164_v2  ;;  %v193_v15 = vld [vmem:[%s1793_s2 + $0x8] sm:$0xff]  ;;  %375 = vrot.lane.b32.xlu2 %v1481_v12, %s1334_s7  ;;  %s1337_s2 = smov 64   ;;  %v1016_v29 = vld [vmem:[#allocation2] ss:$0 sm:$0xff]  ;;  %s1340_s11 = smov 48   ;;  %vm452_vm8 = vcmask 1043456  }
  0x29   :  { %213 = vmatpush.msra.mxu1 %v197_v8  ;;  %s1341_s17 = smov 56   ;;  %s1342_s18 = smov 40   ;;  %vm490_vm9 = vcmask 97280   ;;  %vm734_vm10 = vcmask 392192  }
  0x2a   :  { %s1343_s19 = smov 32   ;;  %s1344_s9 = smov 112  }
  0x2b   :  { %v1019_v4 = vpop.eup %1018  ;;  %214 = vmatpush.msra.mxu1 %v196_v9  ;;  %s1345_s0 = smov 96   ;;  %s1346_s20 = smov 104  }
  0x2c   :  { %v168_v7 = vmul.f32 64.0, %v1019_v4  ;;  %vm172_vm1 = vweird.f32 %v1019_v4  ;;  %s915_s1 = sshll.u32 %s1803_s12, 4  ;;  %s916_s1 = int_to_ptr.hbm [resolvable:$true] %s915_s1 }
  0x2d   :  { %215 = vmatpush.msra.mxu1 %v195_v11 }
  0x2e   :  { %v169_v10 = vsub.f32 1.0, %v168_v7 }
  0x2f   :  { %216 = vmatpush.msra.mxu1 %v194_v13  ;;  %362 = vrot.lane.b32.xlu1 %v1486_v14, %s1334_s7 }
  0x30   :  { %v170_v16 = vmul.f32 %v1019_v4, %v169_v10  ;;  %393 = vrot.lane.b32.xlu2 %v1481_v12, %s1336_s15 }
  0x31   :  { %217 = vmatpush.msra.mxu1 %v193_v15 }
  0x32   :  { %v171_v18 = vadd.f32 %v1019_v4, %v170_v16 }
  0x33   :  { %218 = vmatpush.msra.mxu1 %v192_v17 }
  0x34   :  { %v1504_v19 = vsel %vm172_vm1, %v1019_v4, %v171_v18 }
  0x37   :  { %406 = vrot.lane.b32.xlu1 %v1486_v14, %s1336_s15 }
  0x3c   :  { %397 = vrot.lane.b32.xlu0 %v1486_v14, %s1333_s27 }
  0x44   :  { %257 = vrot.lane.b32.xlu0 %v1486_v14, %s1335_s8 }
  0x4c   :  { %371 = vrot.lane.b32.xlu0 %v1486_v14, %s1337_s2 }
  0x82   :  { %v376_v40 = vpop.permute.xlu2 %375 }
  0x8a   :  { %v394_v42 = vpop.permute.xlu2 %393 }
  0x99   :  { %v411_v33 = vpop.permute.xlu1 %410 }
  0x9b   :  { %v166_v20 = vpop.xlane.xlu0 %165 }
  0x9c   :  { %v174_v21 = vmul.f32 %v1504_v19, %v166_v20  ;;  %v434_v20 = vld [vmem:[#allocation13] sm:$0xff] }
  0x9d   :  { %439 = vst.msk [vmem:[#allocation17] sm:$0xff] %vm438_vm6, %v434_v20 }
  0x9e   :  { %v175_v22 = vadd.f32 1e-05, %v174_v21  ;;  %v435_v21 = vld [vmem:[#allocation13 + $0x8] sm:$0xff] }
  0x9f   :  { %440 = vst.msk [vmem:[#allocation17 + $0x8] sm:$0xff] %vm438_vm6, %v435_v21 }
  0xa0   :  { %1020 = vrsqrt.f32 %v175_v22  ;;  %vm182_vm3 = vweird.f32 %v175_v22 }
  0xa1   :  { %v363_v38 = vpop.permute.xlu1 %362 }
  0xa6   :  { %v1021_v23 = vpop.eup %1020 }
  0xa7   :  { %v177_v24 = vmul.f32 %v1021_v23, %v175_v22  ;;  %vm183_vm2 = vweird.f32 %v1021_v23 }
  0xa8   :  { %vm184_vm4 = vmor %vm182_vm3, %vm183_vm2 }
  0xa9   :  { %v178_v25 = vmul.f32 %v1021_v23, %v177_v24  ;;  %v407_v49 = vpop.permute.xlu1 %406 }
  0xab   :  { %v179_v26 = vmul.f32 0.5, %v178_v25 }
  0xad   :  { %v180_v27 = vsub.f32 1.5, %v179_v26 }
  0xae   :  { %v398_v34 = vpop.permute.xlu0 %397 }
  0xaf   :  { %v181_v28 = vmul.f32 %v1021_v23, %v180_v27 }
  0xb1   :  { %v185_v30 = vsel %vm184_vm4, %v1021_v23, %v181_v28 }
  0xb2   :  { %v186_v31 = vmul.f32 %v185_v30, %v1461_v0 }
  0xb4   :  { %v191_v32 = vmul.f32 %v1016_v29, %v186_v31 }
  0xb6   :  { %964 = vmatmul.msk.f32.vlgmr.msra.gmra.mxu1 %vm163_vm0, %v191_v32  ;;  %v258_v48 = vpop.permute.xlu0 %257 }
  0xbe   :  { %v372_v52 = vpop.permute.xlu0 %371 }
 0x133   :  { %v1515_v35 = vpop.f32.mrf.mxu1 }
 0x134   :  { %v413_v36 = vmul.f32 %v411_v33, %v1515_v35  ;;  %v400_v37 = vmul.f32 %v398_v34, %v1515_v35  ;;  %v365_v39 = vmul.f32 %v363_v38, %v1515_v35  ;;  %v378_v41 = vmul.f32 %v376_v40, %v1515_v35 }
 0x135   :  { %v396_v43 = vmul.f32 %v394_v42, %v1515_v35  ;;  %v260_v51 = vmul.f32 %v258_v48, %v1515_v35  ;;  %v374_v53 = vmul.f32 %v372_v52, %v1515_v35  ;;  %v409_v54 = vmul.f32 %v407_v49, %v1515_v35 }
 0x136   :  { %415 = vrot.lane.b32.xlu1 %v413_v36, %s1338_s16  ;;  %402 = vrot.lane.b32.xlu2 %v400_v37, %s1338_s16  ;;  %v236_v4 = vmul.f32 %v1486_v14, %v1515_v35  ;;  %v225_v33 = vmul.f32 %v1481_v12, %v1515_v35  ;;  %v454_v42 = vrot.slane %v1515_v35, 4 }
 0x13e   :  { %270 = vrot.lane.b32.xlu1 %v1481_v12, %s1335_s8  ;;  %238 = vrot.lane.b32.xlu2 %v1481_v12, %s1324_s22 }
 0x146   :  { %367 = vrot.lane.b32.xlu1 %v365_v39, %s1338_s16  ;;  %358 = vrot.lane.b32.xlu2 %v1481_v12, %s1337_s2 }
 0x14e   :  { %380 = vrot.lane.b32.xlu2 %v378_v41, %s1338_s16 }
 0x156   :  { %227 = vrot.lane.b32.xlu2 %v1486_v14, %s1324_s22 }
 0x15e   :  { %266 = vrot.lane.b32.xlu2 %v1486_v14, %s1339_s10 }
 0x190   :  { %v403_v44 = vpop.permute.xlu2 %402 }
 0x191   :  { %v405_v45 = vsub.f32 %v396_v43, %v403_v44  ;;  %v436_v43 = vld [vmem:[#allocation14] sm:$0xff] }
 0x192   :  { %441 = vst.msk [vmem:[#allocation19] sm:$0xff] %vm438_vm6, %v436_v43 }
 0x193   :  { %420 = vrot.lane.b32.xlu0 %v405_v45, %s1340_s11 }
 0x198   :  { %v239_v46 = vpop.permute.xlu2 %238 }
 0x199   :  { %v241_v47 = vmul.f32 %v239_v46, %v1515_v35 }
 0x19b   :  { %243 = vrot.lane.b32.xlu0 %v241_v47, %s1338_s16 }
 0x1a0   :  { %v359_v50 = vpop.permute.xlu2 %358 }
 0x1a1   :  { %v361_v60 = vmul.f32 %v359_v50, %v1515_v35 }
 0x1a3   :  { %262 = vrot.lane.b32.xlu0 %v260_v51, %s1338_s16 }
 0x1a8   :  { %v416_v55 = vpop.permute.xlu1 %415  ;;  %v381_v56 = vpop.permute.xlu2 %380 }
 0x1a9   :  { %v418_v57 = vadd.f32 %v416_v55, %v409_v54  ;;  %v383_v58 = vadd.f32 %v381_v56, %v374_v53  ;;  %v1614_v53 = vld [vmem:[#allocation11] sm:$0xff] }
 0x1ab   :  { %424 = vrot.lane.b32.xlu1 %v418_v57, %s1341_s17  ;;  %389 = vrot.lane.b32.xlu0 %v383_v58, %s1334_s7 }
 0x1b0   :  { %v271_v59 = vpop.permute.xlu1 %270  ;;  %v228_v1 = vpop.permute.xlu2 %227 }
 0x1b1   :  { %v273_v62 = vmul.f32 %v271_v59, %v1515_v35  ;;  %v230_v2 = vmul.f32 %v228_v1, %v1515_v35 }
 0x1b3   :  { %253 = vrot.lane.b32.xlu1 %v1481_v12, %s1339_s10 }
 0x1b8   :  { %v368_v61 = vpop.permute.xlu1 %367  ;;  %v267_v15 = vpop.permute.xlu2 %266 }
 0x1b9   :  { %v370_v63 = vsub.f32 %v361_v60, %v368_v61  ;;  %v269_v16 = vmul.f32 %v267_v15, %v1515_v35 }
 0x1bb   :  { %275 = vrot.lane.b32.xlu1 %v273_v62, %s1338_s16  ;;  %385 = vrot.lane.b32.xlu2 %v370_v63, %s1337_s2 }
 0x1c3   :  { %232 = vrot.lane.b32.xlu2 %v230_v2, %s1338_s16 }
 0x205   :  { %v421_v3 = vpop.permute.xlu0 %420 }
 0x20d   :  { %v244_v5 = vpop.permute.xlu0 %243 }
 0x20e   :  { %v246_v6 = vadd.f32 %v244_v5, %v236_v4 }
 0x210   :  { %248 = vrot.lane.b32.xlu0 %v246_v6, %s1324_s22 }
 0x215   :  { %v263_v11 = vpop.permute.xlu0 %262  ;;  %v386_v26 = vpop.permute.xlu2 %385 }
 0x218   :  { %292 = vrot.lane.b32.xlu0 %v1486_v14, %s1342_s18 }
 0x21d   :  { %v425_v7 = vpop.permute.xlu1 %424  ;;  %v390_v22 = vpop.permute.xlu0 %389 }
 0x21e   :  { %v427_v8 = vsel %vm251_vm5, %v421_v3, %v425_v7  ;;  %v392_v27 = vsel %vm251_vm5, %v386_v26, %v390_v22  ;;  %v233_v32 = vpop.permute.xlu2 %232 }
 0x21f   :  { %429 = vrot.lane.b32.xlu1 %v427_v8, %s1339_s10  ;;  %v235_v36 = vsub.f32 %v225_v33, %v233_v32 }
 0x220   :  { %340 = vrot.lane.b32.xlu0 %v1481_v12, %s1341_s17 }
 0x225   :  { %v254_v9 = vpop.permute.xlu1 %253 }
 0x226   :  { %v256_v10 = vmul.f32 %v254_v9, %v1515_v35 }
 0x228   :  { %v265_v13 = vsub.f32 %v256_v10, %v263_v11  ;;  %288 = vrot.lane.b32.xlu0 %v1481_v12, %s1343_s19 }
 0x22a   :  { %280 = vrot.lane.b32.xlu1 %v265_v13, %s1344_s9 }
 0x22d   :  { %v276_v17 = vpop.permute.xlu1 %275 }
 0x22e   :  { %v278_v18 = vadd.f32 %v276_v17, %v269_v16 }
 0x230   :  { %284 = vrot.lane.b32.xlu2 %v278_v18, %s1338_s16  ;;  %301 = vrot.lane.b32.xlu0 %v1486_v14, %s1343_s19 }
 0x232   :  { %305 = vrot.lane.b32.xlu1 %v1481_v12, %s1342_s18 }
 0x238   :  { %327 = vrot.lane.b32.xlu2 %v1486_v14, %s1341_s17  ;;  %323 = vrot.lane.b32.xlu0 %v1481_v12, %s1340_s11  ;;  %s1348_s17 = smov [#allocation19]  }
 0x239   :  { %s936_s18 = sshll.u32 %s1348_s17, 4  ;;  %s937_s18 = int_to_ptr.vmem [resolvable:$true] %s936_s18 }
 0x240   :  { %336 = vrot.lane.b32.xlu0 %v1486_v14, %s1340_s11 }
 0x282   :  { %v249_v23 = vpop.permute.xlu0 %248 }
 0x283   :  { %v252_v37 = vsel %vm251_vm5, %v235_v36, %v249_v23 }
 0x28a   :  { %v293_v24 = vpop.permute.xlu0 %292  ;;  %v285_v39 = vpop.permute.xlu2 %284 }
 0x28b   :  { %v295_v25 = vmul.f32 %v293_v24, %v1515_v35 }
 0x28d   :  { %297 = vrot.lane.b32.xlu0 %v295_v25, %s1338_s16 }
 0x291   :  { %v430_v28 = vpop.permute.xlu1 %429 }
 0x292   :  { %v433_v14 = vsel %vm432_vm7, %v392_v27, %v430_v28  ;;  %v341_v29 = vpop.permute.xlu0 %340  ;;  %v328_v45 = vpop.permute.xlu2 %327 }
 0x293   :  { %v450_v30 = vrot.slane %v433_v14, 4  ;;  %v343_v31 = vmul.f32 %v341_v29, %v1515_v35  ;;  %443 = vst.msk [vmem:[#allocation17 + $0x4] sm:$0xff] %vm438_vm6, %v433_v14  ;;  %v330_v61 = vmul.f32 %v328_v45, %v1515_v35 }
 0x295   :  { %965 = vmatpush.xpose.msk.msra.mxu3 %vm432_vm7, %v450_v30  ;;  %345 = vrot.lane.b32.xlu0 %v343_v31, %s1338_s16  ;;  %v453_v34 = vsel %vm452_vm8, %v434_v20, %v450_v30 }
 0x299   :  { %966 = vmatpush.xpose.msk.msra.mxu3 %vm432_vm7, %v453_v34 }
 0x29a   :  { %v289_v44 = vpop.permute.xlu0 %288 }
 0x29b   :  { %v291_v2 = vmul.f32 %v289_v44, %v1515_v35 }
 0x29c   :  { %v281_v38 = vpop.permute.xlu1 %280  ;;  %967 = vmatmul.msk.f32.vlgmr.msra.gmra.mxu3 %vm432_vm7, %v252_v37 }
 0x29d   :  { %970 = vmatpush.xpose.msk.msrb.mxu3 %vm432_vm7, %v450_v30  ;;  %v287_v40 = vsel %vm251_vm5, %v281_v38, %v285_v39 }
 0x2a1   :  { %971 = vmatpush.xpose.msk.msrb.mxu3 %vm432_vm7, %v453_v34 }
 0x2a2   :  { %v302_v46 = vpop.permute.xlu0 %301 }
 0x2a3   :  { %v304_v47 = vmul.f32 %v302_v46, %v1515_v35 }
 0x2a4   :  { %v306_v41 = vpop.permute.xlu1 %305  ;;  %972 = vmatmul.msk.f32.vlgmr.msrb.gmra.mxu3 %vm432_vm7, %v287_v40 }
 0x2a5   :  { %v308_v12 = vmul.f32 %v306_v41, %v1515_v35 }
 0x2a7   :  { %310 = vrot.lane.b32.xlu2 %v308_v12, %s1338_s16 }
 0x2aa   :  { %v324_v62 = vpop.permute.xlu0 %323 }
 0x2ab   :  { %v326_v17 = vmul.f32 %v324_v62, %v1515_v35 }
 0x2af   :  { %455 = vrot.lane.b32.xlu2 %v454_v42, %s1343_s19 }
 0x2b2   :  { %v337_v63 = vpop.permute.xlu0 %336 }
 0x2b3   :  { %v339_v23 = vmul.f32 %v337_v63, %v1515_v35 }
 0x2ff   :  { %v298_v1 = vpop.permute.xlu0 %297 }
 0x300   :  { %v300_v3 = vsub.f32 %v291_v2, %v298_v1 }
 0x301   :  { %v311_v48 = vpop.permute.xlu2 %310 }
 0x302   :  { %v313_v49 = vadd.f32 %v311_v48, %v304_v47 }
 0x307   :  { %v346_v22 = vpop.permute.xlu0 %345 }
 0x308   :  { %v348_v24 = vadd.f32 %v346_v22, %v339_v23 }
 0x309   :  { %v1602_v50 = vpop.permute.xlu2 %455 }
 0x30a   :  { %968 = vmatpush.msk.msra.mxu2 %vm452_vm8, %v1602_v50  ;;  %v1608_v51 = vsel %vm452_vm8, %v436_v43, %v1602_v50 }
 0x30c   :  { %522 = vmatpush.msra.mxu2 %v1608_v51 }
 0x30e   :  { %973 = vmatpush.msk.msrb.mxu2 %vm452_vm8, %v1602_v50 }
 0x310   :  { %581 = vmatpush.msrb.mxu2 %v1608_v51 }
 0x31f   :  { %v485_v52 = vpop.f32.mrf.mxu3 }
 0x320   :  { %v488_v54 = vmul.f32 0.25, %v485_v52 }
 0x322   :  { %v489_v55 = vadd.f32 %v488_v54, %v1614_v53 }
 0x324   :  { %v491_v56 = vsel %vm490_vm9, %v489_v55, -inf }
 0x325   :  { %492 = vmax.xlane.f32.xlu1 %v491_v56 }
 0x327   :  { %v547_v57 = vpop.f32.mrf.mxu3 }
 0x328   :  { %v550_v58 = vmul.f32 0.25, %v547_v57 }
 0x32a   :  { %v551_v59 = vadd.f32 %v550_v58, %v1614_v53  ;;  %v437_v58 = vld [vmem:[#allocation14 + $0x8] sm:$0xff] }
 0x32b   :  { %442 = vst.msk [vmem:[#allocation19 + $0x8] sm:$0xff] %vm438_vm6, %v437_v58  ;;  %v878_v58 = vld [vmem:[%s1797_s6 + $0x40] sm:$0xff] }
 0x32c   :  { %v552_v60 = vsel %vm490_vm9, %v551_v59, -inf }
 0x32d   :  { %553 = vmax.xlane.f32.xlu2 %v552_v60 }
 0x33e   :  { %332 = vrot.lane.b32.xlu1 %v330_v61, %s1338_s16 }
 0x345   :  { %588 = vrot.lane.b32.xlu2 %v450_v30, %s1344_s9 }
 0x34d   :  { %586 = vrot.lane.b32.xlu2 %v453_v34, %s1344_s9 }
 0x355   :  { %315 = vrot.lane.b32.xlu2 %v300_v3, %s1345_s0  ;;  %s938_s0 = sshll.u32 %s1805_s14, 4  ;;  %s939_s0 = int_to_ptr.hbm [resolvable:$true] %s938_s0 }
 0x398   :  { %v493_v4 = vpop.xlane.xlu1 %492 }
 0x399   :  { %v494_v5 = vsub.f32 %v489_v55, %v493_v4  ;;  %v743_v4 = vld [vmem:[#allocation5 + $0x38] sm:$0xff] }
 0x39b   :  { %v495_v6 = vmul.f32 1.442695, %v494_v5  ;;  %v742_v5 = vld [vmem:[#allocation5 + $0x30] sm:$0xff] }
 0x39d   :  { %1022 = vpow2.f32 %v495_v6  ;;  %v741_v6 = vld [vmem:[#allocation5 + $0x28] sm:$0xff] }
 0x3a0   :  { %v554_v7 = vpop.xlane.xlu2 %553 }
 0x3a1   :  { %v555_v8 = vsub.f32 %v551_v59, %v554_v7  ;;  %v740_v7 = vld [vmem:[#allocation5 + $0x20] sm:$0xff] }
 0x3a3   :  { %v1023_v9 = vpop.eup %1022  ;;  %v556_v10 = vmul.f32 1.442695, %v555_v8  ;;  %v739_v8 = vld [vmem:[#allocation5 + $0x18] sm:$0xff] }
 0x3a4   :  { %v497_v11 = vsel %vm490_vm9, %v1023_v9, 0.0 }
 0x3a5   :  { %1024 = vpow2.f32 %v556_v10  ;;  %498 = vadd.xlane.f32.xlu0 %v497_v11  ;;  %v737_v10 = vld [vmem:[#allocation5 + $0x8] sm:$0xff]  ;;  %v736_v11 = vld [vmem:[#allocation5] sm:$0xff] }
 0x3a8   :  { %v589_v13 = vpop.permute.xlu2 %588 }
 0x3a9   :  { %975 = vmatpush.xpose.msk.msrb.mxu1 %vm432_vm7, %v589_v13 }
 0x3ab   :  { %v1025_v15 = vpop.eup %1024 }
 0x3ac   :  { %v558_v16 = vsel %vm490_vm9, %v1025_v15, 0.0 }
 0x3ad   :  { %559 = vadd.xlane.f32.xlu1 %v558_v16 }
 0x3b0   :  { %v587_v18 = vpop.permute.xlu2 %586  ;;  %v333_v20 = vpop.permute.xlu1 %332 }
 0x3b1   :  { %v335_v21 = vsub.f32 %v326_v17, %v333_v20  ;;  %976 = vmatpush.xpose.msk.msrb.mxu1 %vm432_vm7, %v587_v18 }
 0x3b3   :  { %350 = vrot.lane.b32.xlu2 %v335_v21, %s1336_s15 }
 0x3b5   :  { %755 = vmatpush.msra.mxu1 %v743_v4  ;;  %v870_v4 = vld [vmem:[%s1797_s6] sm:$0xff] }
 0x3b7   :  { %756 = vmatpush.msra.mxu1 %v742_v5 }
 0x3b8   :  { %v316_v26 = vpop.permute.xlu2 %315 }
 0x3b9   :  { %319 = vrot.lane.b32.xlu0 %v313_v49, %s1346_s20  ;;  %757 = vmatpush.msra.mxu1 %v741_v6  ;;  %s1349_s20 = smov [#allocation16]  }
 0x3bb   :  { %354 = vrot.lane.b32.xlu2 %v348_v24, %s1333_s27  ;;  %758 = vmatpush.msra.mxu1 %v740_v7 }
 0x3bd   :  { %759 = vmatpush.msra.mxu1 %v739_v8 }
 0x40d   :  { %v351_v29 = vpop.permute.xlu2 %350 }
 0x415   :  { %v355_v34 = vpop.permute.xlu2 %354 }
 0x416   :  { %v357_v36 = vsel %vm251_vm5, %v351_v29, %v355_v34  ;;  %v798_v29 = vld [vmem:[%s1796_s5 + $0x40] sm:$0xff]  ;;  %v795_v34 = vld [vmem:[%s1796_s5 + $0x28] sm:$0xff] }
 0x418   :  { %v499_v25 = vpop.xlane.xlu0 %498 }
 0x419   :  { %1026 = vrcp.f32 %v499_v25  ;;  %v804_v25 = vld [vmem:[%s1796_s5 + $0x70] sm:$0xff] }
 0x41f   :  { %v1027_v27 = vpop.eup %1026 }
 0x420   :  { %v560_v28 = vpop.xlane.xlu1 %559  ;;  %v501_v14 = vmul.f32 %v1027_v27, %v1023_v9  ;;  %v738_v9 = vld [vmem:[#allocation5 + $0x10] sm:$0xff]  ;;  %v803_v27 = vld [vmem:[%s1796_s5 + $0x68] sm:$0xff] }
 0x421   :  { %1028 = vrcp.f32 %v560_v28  ;;  %760 = vmatpush.msra.mxu1 %v738_v9  ;;  %v800_v28 = vld [vmem:[%s1796_s5 + $0x50] sm:$0xff] }
 0x422   :  { %969 = vmatmul.msk.f32.vlgmr.msra.gmra.mxu2 %vm490_vm9, %v501_v14  ;;  %v801_v14 = vld [vmem:[%s1796_s5 + $0x58] sm:$0xff] }
 0x423   :  { %980 = vmatpush.xpose.msk.msra.mxu2 %vm432_vm7, %v589_v13  ;;  %761 = vmatpush.msra.mxu1 %v737_v10 }
 0x425   :  { %762 = vmatpush.msra.mxu1 %v736_v11 }
 0x427   :  { %v1029_v30 = vpop.eup %1028  ;;  %981 = vmatpush.xpose.msk.msra.mxu2 %vm432_vm7, %v587_v18 }
 0x428   :  { %v562_v31 = vmul.f32 %v1029_v30, %v1025_v15  ;;  %v799_v30 = vld [vmem:[%s1796_s5 + $0x48] sm:$0xff] }
 0x42a   :  { %974 = vmatmul.msk.f32.vlgmr.msrb.gmra.mxu2 %vm490_vm9, %v562_v31  ;;  %v796_v31 = vld [vmem:[%s1796_s5 + $0x30] sm:$0xff] }
 0x42b   :  { %v320_v32 = vpop.permute.xlu0 %319 }
 0x42c   :  { %v322_v33 = vsel %vm251_vm5, %v316_v26, %v320_v32  ;;  %v805_v26 = vld [vmem:[%s1796_s5 + $0x78] sm:$0xff] }
 0x42d   :  { %977 = vmatmul.msk.f32.vlgmr.msrb.gmra.mxu1 %vm432_vm7, %v322_v33  ;;  %837 = vmatpush.msrb.mxu2 %v805_v26  ;;  %v797_v32 = vld [vmem:[%s1796_s5 + $0x38] sm:$0xff]  ;;  %v794_v33 = vld [vmem:[%s1796_s5 + $0x20] sm:$0xff] }
 0x42f   :  { %838 = vmatpush.msrb.mxu2 %v803_v27 }
 0x431   :  { %839 = vmatpush.msrb.mxu2 %v801_v14 }
 0x432   :  { %982 = vmatmul.msk.f32.vlgmr.msra.gmra.mxu2 %vm432_vm7, %v357_v36  ;;  %v792_v36 = vld [vmem:[%s1796_s5 + $0x10] sm:$0xff] }
 0x433   :  { %840 = vmatpush.msrb.mxu2 %v799_v30 }
 0x435   :  { %841 = vmatpush.msrb.mxu2 %v797_v32 }
 0x437   :  { %842 = vmatpush.msrb.mxu2 %v795_v34 }
 0x4a5   :  { %v1641_v37 = vpop.f32.mrf.mxu2 }
 0x4aa   :  { %v614_v38 = vpop.f32.mrf.mxu1 }
 0x4ab   :  { %v617_v39 = vmul.f32 0.25, %v614_v38  ;;  %v790_v38 = vld [vmem:[%s1796_s5] sm:$0xff] }
 0x4ad   :  { %v583_v40 = vpop.f32.mrf.mxu2  ;;  %v618_v41 = vadd.f32 %v617_v39, %v1614_v53  ;;  %v791_v39 = vld [vmem:[%s1796_s5 + $0x8] sm:$0xff] }
 0x4af   :  { %v619_v12 = vsel %vm490_vm9, %v618_v41, -inf }
 0x4b0   :  { %620 = vmax.xlane.f32.xlu1 %v619_v12 }
 0x4b5   :  { %v681_v42 = vpop.f32.mrf.mxu2 }
 0x4b6   :  { %v684_v43 = vmul.f32 0.25, %v681_v42 }
 0x4b8   :  { %v685_v44 = vadd.f32 %v684_v43, %v1614_v53 }
 0x4ba   :  { %v686_v45 = vsel %vm490_vm9, %v685_v44, -inf }
 0x4bb   :  { %687 = vmax.xlane.f32.xlu2 %v686_v45 }
 0x4c9   :  { %633 = vrot.lane.b32.xlu1 %v1602_v50, %s1344_s9 }
 0x4d3   :  { %631 = vrot.lane.b32.xlu2 %v1608_v51, %s1344_s9 }
 0x523   :  { %v621_v46 = vpop.xlane.xlu1 %620 }
 0x524   :  { %v622_v47 = vsub.f32 %v618_v41, %v621_v46 }
 0x526   :  { %v623_v48 = vmul.f32 1.442695, %v622_v47 }
 0x528   :  { %1030 = vpow2.f32 %v623_v48  ;;  %v1017_v48 = vld [vmem:[#allocation7] ss:$0 sm:$0xff] }
 0x52e   :  { %v1031_v49 = vpop.eup %1030  ;;  %v688_v52 = vpop.xlane.xlu2 %687 }
 0x52f   :  { %v689_v54 = vsub.f32 %v685_v44, %v688_v52  ;;  %v625_v55 = vsel %vm490_vm9, %v1031_v49, 0.0 }
 0x530   :  { %626 = vadd.xlane.f32.xlu0 %v625_v55  ;;  %v884_v55 = vld [vmem:[%s1797_s6 + $0x70] sm:$0xff] }
 0x531   :  { %v690_v53 = vmul.f32 1.442695, %v689_v54 }
 0x533   :  { %1032 = vpow2.f32 %v690_v53  ;;  %v883_v53 = vld [vmem:[%s1797_s6 + $0x68] sm:$0xff] }
 0x536   :  { %v632_v51 = vpop.permute.xlu2 %631 }
 0x539   :  { %v1033_v56 = vpop.eup %1032 }
 0x53a   :  { %v692_v57 = vsel %vm490_vm9, %v1033_v56, 0.0 }
 0x53b   :  { %693 = vadd.xlane.f32.xlu1 %v692_v57  ;;  %v634_v50 = vpop.permute.xlu1 %633  ;;  %v881_v57 = vld [vmem:[%s1797_s6 + $0x58] sm:$0xff] }
 0x53c   :  { %978 = vmatpush.msk.msra.mxu3 %vm452_vm8, %v634_v50  ;;  %983 = vmatpush.msk.msra.mxu0 %vm452_vm8, %v634_v50  ;;  %v880_v50 = vld [vmem:[%s1797_s6 + $0x50] sm:$0xff] }
 0x53e   :  { %656 = vmatpush.msra.mxu3 %v632_v51  ;;  %715 = vmatpush.msra.mxu0 %v632_v51  ;;  %v879_v51 = vld [vmem:[%s1797_s6 + $0x48] sm:$0xff] }
 0x540   :  { %817 = vmatpush.msrb.mxu3 %v804_v25 }
 0x544   :  { %721 = vrot.lane.b32.xlu0 %v583_v40, %s1339_s10 }
 0x554   :  { %445 = vrot.lane.b32.xlu1 %v1515_v35, %s1343_s19 }
 0x5a3   :  { %v627_v59 = vpop.xlane.xlu0 %626 }
 0x5a4   :  { %1034 = vrcp.f32 %v627_v59  ;;  %v877_v59 = vld [vmem:[%s1797_s6 + $0x38] sm:$0xff] }
 0x5aa   :  { %v1035_v60 = vpop.eup %1034 }
 0x5ab   :  { %v629_v61 = vmul.f32 %v1035_v60, %v1031_v49  ;;  %v876_v60 = vld [vmem:[%s1797_s6 + $0x30] sm:$0xff] }
 0x5ad   :  { %979 = vmatmul.msk.f32.vlgmr.msra.gmra.mxu3 %vm490_vm9, %v629_v61  ;;  %v875_v61 = vld [vmem:[%s1797_s6 + $0x28] sm:$0xff] }
 0x5ae   :  { %v694_v62 = vpop.xlane.xlu1 %693 }
 0x5af   :  { %1036 = vrcp.f32 %v694_v62  ;;  %v874_v62 = vld [vmem:[%s1797_s6 + $0x20] sm:$0xff] }
 0x5b5   :  { %v1037_v63 = vpop.eup %1036 }
 0x5b6   :  { %v696_v1 = vmul.f32 %v1037_v63, %v1033_v56  ;;  %v722_v13 = vpop.permute.xlu0 %721  ;;  %v882_v56 = vld [vmem:[%s1797_s6 + $0x60] sm:$0xff]  ;;  %v873_v63 = vld [vmem:[%s1797_s6 + $0x18] sm:$0xff] }
 0x5b7   :  { %v732_v15 = vsel %vm432_vm7, %v1641_v37, %v722_v13  ;;  %v793_v37 = vld [vmem:[%s1796_s5 + $0x18] sm:$0xff] }
 0x5b8   :  { %984 = vmatmul.msk.f32.vlgmr.msra.gmra.mxu0 %vm490_vm9, %v696_v1  ;;  %843 = vmatpush.msrb.mxu2 %v793_v37  ;;  %v872_v1 = vld [vmem:[%s1797_s6 + $0x10] sm:$0xff] }
 0x5ba   :  { %844 = vmatpush.msrb.mxu2 %v791_v39 }
 0x5c6   :  { %v446_v2 = vpop.permute.xlu1 %445 }
 0x5c7   :  { %448 = vst.msk [vmem:[#allocation19 + $0x4] sm:$0xff] %vm438_vm6, %v446_v2 }
 0x630   :  { %v658_v3 = vpop.f32.mrf.mxu3 }
 0x631   :  { %725 = vrot.lane.b32.xlu0 %v658_v3, %s1343_s19 }
 0x635   :  { %v717_v35 = vpop.f32.mrf.mxu0 }
 0x636   :  { %729 = vrot.lane.b32.xlu2 %v717_v35, %s1340_s11  ;;  %v871_v35 = vld [vmem:[%s1797_s6 + $0x8] sm:$0xff]  ;;  %s925_s11 = sshll.u32 %s1804_s13, 4  ;;  %s913_s13 = sshll.u32 %s1349_s20, 4  ;;  %s926_s11 = int_to_ptr.hbm [resolvable:$true] %s925_s11  ;;  %s914_s13 = int_to_ptr.vmem [resolvable:$true] %s913_s13 }
 0x690   :  { %v730_v17 = vpop.permute.xlu2 %729 }
 0x6a3   :  { %v726_v16 = vpop.permute.xlu0 %725 }
 0x6a4   :  { %v733_v18 = vsel %vm438_vm6, %v732_v15, %v726_v16 }
 0x6a5   :  { %v735_v20 = vsel %vm734_vm10, %v733_v18, %v730_v17 }
 0x6a6   :  { %985 = vmatmul.msk.f32.vlgmr.msra.gmra.mxu1 %vm163_vm0, %v735_v20 }
 0x723   :  { %v764_v21 = vpop.f32.mrf.mxu1 }
 0x724   :  { %v1669_v22 = vadd.f32 %v764_v21, %v1461_v0  ;;  %v802_v0 = vld [vmem:[%s1796_s5 + $0x60] sm:$0xff] }
 0x725   :  { %818 = vmatpush.msrb.mxu3 %v802_v0 }
 0x726   :  { %v768_v23 = vmul.f32 %v1669_v22, %v1669_v22 }
 0x727   :  { %819 = vmatpush.msrb.mxu3 %v800_v28 }
 0x728   :  { %v769_v24 = vsel %vm163_vm0, %v768_v23, 0.0 }
 0x729   :  { %770 = vadd.xlane.f32.xlu0 %v769_v24  ;;  %820 = vmatpush.msrb.mxu3 %v798_v29 }
 0x72b   :  { %821 = vmatpush.msrb.mxu3 %v796_v31 }
 0x72d   :  { %822 = vmatpush.msrb.mxu3 %v794_v33 }
 0x72f   :  { %823 = vmatpush.msrb.mxu3 %v792_v36 }
 0x731   :  { %824 = vmatpush.msrb.mxu3 %v790_v38 }
 0x79c   :  { %v771_v40 = vpop.xlane.xlu0 %770 }
 0x79d   :  { %v772_v41 = vmul.f32 %v771_v40, %v1504_v19  ;;  %v885_v19 = vld [vmem:[%s1797_s6 + $0x78] sm:$0xff]  ;;  %s1347_s6 = smov [#allocation17]  }
 0x79e   :  { %886 = vmatpush.msrb.mxu0 %v885_v19  ;;  %s923_s2 = sshll.u32 %s1347_s6, 4  ;;  %s924_s2 = int_to_ptr.vmem [resolvable:$true] %s923_s2 }
 0x79f   :  { %v773_v12 = vadd.f32 1e-05, %v772_v41  ;;  %931 = dma.vmem_to_hbm [thread:$0]  %s924_s2, 256, %s926_s11, [#allocation18], %s1323_s21, %s1323_s21, %s1324_s22  }
 0x7a0   :  { %887 = vmatpush.msrb.mxu0 %v884_v55  ;;  %944 = dma.vmem_to_hbm [thread:$0]  %s937_s18, 256, %s939_s0, [#allocation18], %s1323_s21, %s1323_s21, %s1324_s22  }
 0x7a1   :  { %1038 = vrsqrt.f32 %v773_v12  ;;  %vm780_vm12 = vweird.f32 %v773_v12 }
 0x7a2   :  { %888 = vmatpush.msrb.mxu0 %v883_v53 }
 0x7a4   :  { %889 = vmatpush.msrb.mxu0 %v882_v56 }
 0x7a6   :  { %890 = vmatpush.msrb.mxu0 %v881_v57 }
 0x7a7   :  { %v1039_v42 = vpop.eup %1038 }
 0x7a8   :  { %v775_v43 = vmul.f32 %v1039_v42, %v773_v12  ;;  %vm781_vm11 = vweird.f32 %v1039_v42  ;;  %891 = vmatpush.msrb.mxu0 %v880_v50 }
 0x7a9   :  { %vm782_vm13 = vmor %vm780_vm12, %vm781_vm11 }
 0x7aa   :  { %v776_v44 = vmul.f32 %v1039_v42, %v775_v43  ;;  %892 = vmatpush.msrb.mxu0 %v879_v51 }
 0x7ac   :  { %v777_v45 = vmul.f32 0.5, %v776_v44  ;;  %893 = vmatpush.msrb.mxu0 %v878_v58 }
 0x7ae   :  { %v778_v46 = vsub.f32 1.5, %v777_v45  ;;  %894 = vmatpush.msrb.mxu0 %v877_v59 }
 0x7b0   :  { %v779_v47 = vmul.f32 %v1039_v42, %v778_v46  ;;  %895 = vmatpush.msrb.mxu0 %v876_v60 }
 0x7b2   :  { %v783_v49 = vsel %vm782_vm13, %v1039_v42, %v779_v47  ;;  %896 = vmatpush.msrb.mxu0 %v875_v61 }
 0x7b3   :  { %v784_v52 = vmul.f32 %v783_v49, %v1669_v22 }
 0x7b4   :  { %897 = vmatpush.msrb.mxu0 %v874_v62 }
 0x7b5   :  { %v789_v54 = vmul.f32 %v1017_v48, %v784_v52 }
 0x7b6   :  { %898 = vmatpush.msrb.mxu0 %v873_v63 }
 0x7b7   :  { %986 = vmatmul.msk.f32.vlgmr.msrb.gmra.mxu3 %vm163_vm0, %v789_v54  ;;  %987 = vmatmul.msk.f32.vlgmr.msrb.gmra.mxu2 %vm163_vm0, %v789_v54 }
 0x7b8   :  { %899 = vmatpush.msrb.mxu0 %v872_v1 }
 0x7ba   :  { %900 = vmatpush.msrb.mxu0 %v871_v35 }
 0x7bc   :  { %901 = vmatpush.msrb.mxu0 %v870_v4 }
 0x83a   :  { %v826_v2 = vpop.f32.mrf.mxu3  ;;  %v846_v23 = vpop.f32.mrf.mxu2 }
 0x83b   :  { %v849_v3 = vsub.f32 0.0, %v826_v2 }
 0x83d   :  { %v850_v5 = vmul.f32 1.442695, %v849_v3 }
 0x83f   :  { %1040 = vpow2.f32 %v850_v5 }
 0x845   :  { %v1041_v6 = vpop.eup %1040 }
 0x846   :  { %v852_v7 = vadd.f32 1.0, %v1041_v6 }
 0x848   :  { %1042 = vrcp.f32 %v852_v7  ;;  %v864_v11 = vand.u32 2147483648, %v852_v7  ;;  %v862_v15 = vand.u32 2147483647, %v852_v7  ;;  %vm858_vm15 = vweird.f32 %v852_v7 }
 0x84a   :  { %v865_v17 = vor.u32 1.1754944e-38, %v864_v11  ;;  %vm863_vm2 = vcmp.eq.f32.partialorder %v862_v15, 8.507059e+37 }
 0x84e   :  { %v1043_v8 = vpop.eup %1042 }
 0x84f   :  { %v854_v9 = vmul.f32 %v1043_v8, %v852_v7  ;;  %vm859_vm14 = vweird.f32 %v1043_v8 }
 0x850   :  { %vm860_vm1 = vmor %vm858_vm15, %vm859_vm14 }
 0x851   :  { %v855_v10 = vsub.f32 1.0, %v854_v9 }
 0x853   :  { %v856_v13 = vmul.f32 %v1043_v8, %v855_v10 }
 0x855   :  { %v857_v16 = vadd.f32 %v1043_v8, %v856_v13 }
 0x857   :  { %v861_v18 = vsel %vm860_vm1, %v1043_v8, %v857_v16 }
 0x858   :  { %v866_v20 = vsel %vm863_vm2, %v865_v17, %v861_v18 }
 0x859   :  { %v868_v21 = vmul.f32 %v866_v20, %v826_v2 }
 0x85b   :  { %v869_v24 = vmul.f32 %v868_v21, %v846_v23 }
 0x85d   :  { %902 = vmatmul.f32.vlgmr.msrb.gmra.mxu0 %v869_v24 }
 0x8da   :  { %v903_v25 = vpop.f32.mrf.mxu0 }
 0x8db   :  { %v906_v26 = vadd.f32 %v903_v25, %v1669_v22 }
 0x8dd   :  { %907 = vst.msk [vmem:[#allocation16] sm:$0xff] %vm163_vm0, %v906_v26 }
 0x8de   :  { %918 = dma.vmem_to_hbm [thread:$0]  %s914_s13, 128, %s916_s1, [#allocation4]  }
 0x8df   :  { %1318 = dma.done.wait [#allocation4], 128  }
 0x8e0   :  { %1319 = vsyncadd [#allocation4], 4294967168 }
 0x8e1   :  { %1320 = dma.done.wait [#allocation18], 512  }
 0x8e2   :  { %1321 = vsyncadd [#allocation18], 4294966784 }
 0x8e3   :  { %957 = vsyncpa [#allocation3], 1 }
 0x8e4   :  { %958 = vsyncpa [#allocation6], 1 }
 0x8e5   :  { %959 = vsyncpa [#allocation9], 1 }
 0x8e6   :  { %960 = vsyncpa [#allocation12], 1 }
 0x8e7   :  { %961 = vsyncpa [#allocation15], 1 }
 0x8e8   :  { %962 = vsyncpa [#allocation4], 1 }
 0x8e9   :  { %963 = vsyncpa [#allocation18], 1 }

</bundles_post_ra>
